<compile_context>
chip_gen: v5e
topology: v5e:2x2
jax: 0.10.0
libtpu: 0.0.40
codegen_flags: <defaults>
</compile_context>

<pallas_src>
import jax
import jax.numpy as jnp
from jax.experimental import pallas as pl
from jax.experimental.pallas import tpu as pltpu

# ----------------------------- configuration ------------------------------
MODALITY_TYPES = ("language", "video", "audio")
MISSING_TYPE_INDEX = {"language": 1, "video": 2, "audio": 3}
M = len(MODALITY_TYPES)

B = 8            # batch (small demo size)
FEATURE_DIMS = 32
FUSION_DIM = 32
OUTPUT_DIMS = 8
LN_EPS = 1e-5


# ------------------------------ Pallas kernel ------------------------------
def fusion_kernel(x_ref, mask_ref, w_ref, w1_ref, b1_ref, w2_ref, b2_ref, out_ref):
    """One batch tile per grid step; batch lives on the 128-lane axis.

    x_ref   : (M*F+1, TB) bf16   [x^T ; ones]   (ones row folds every bias)
    mask_ref: (M, TB)     f32    1.0 where modality m is missing
    w_ref   : (M*D+M, M*F+1) bf16  block-diag proj^T + folded score rows + bias col
    w1_ref  : (D, D)  bf16   head linear 1, LayerNorm affine folded in
    b1_ref  : (D, 1)  f32
    w2_ref  : (O, D)  bf16
    b2_ref  : (O, 1)  f32
    out_ref : (O, TB) f32    (lane-dense, unpadded)
    """
    n_modal = mask_ref.shape[0]
    d = w1_ref.shape[0]

    # One fused bf16 MXU matmul: all modal projections + score rows + biases.
    y = jnp.dot(w_ref[...], x_ref[...], preferred_element_type=jnp.float32)

    # Softmax over the M score rows: pure VPU elementwise ops on (1, TB) rows.
    s = []
    for m in range(n_modal):
        r = n_modal * d + m
        sm = y[r:r + 1, :]
        # Missing modality -> -inf score -> softmax weight exactly 0.
        s.append(jnp.where(mask_ref[m:m + 1, :] > 0.0, -jnp.inf, sm))
    smax = s[0]
    for m in range(1, n_modal):
        smax = jnp.maximum(smax, s[m])
    e = [jnp.exp(sm - smax) for sm in s]
    denom = e[0]
    for m in range(1, n_modal):
        denom = denom + e[m]
    # Approximate reciprocal (EUP slot). The per-sample scale error cancels
    # exactly through the LayerNorm below (per-sample scale invariance).
    # Do NOT keep approx=True if the LN is ever removed / a residual is added.
    inv = pl.reciprocal(denom, approx=True)

    # fused^T = sum_m attn_m * data_m^T  (attn broadcast along the D sublanes)
    fused = (e[0] * inv) * y[0:d, :]
    for m in range(1, n_modal):
        fused = fused + (e[m] * inv) * y[m * d:(m + 1) * d, :]

    # LayerNorm over D (sublane axis); gamma/beta folded into w1/b1.
    mean = jnp.mean(fused, axis=0, keepdims=True)
    var = jnp.mean((fused - mean) ** 2, axis=0, keepdims=True)
    z = (fused - mean) * jax.lax.rsqrt(var + LN_EPS)

    # Head: Linear -> ReLU -> (Dropout = identity at eval) -> Linear.
    h = jnp.dot(w1_ref[...], z.astype(jnp.bfloat16),
                preferred_element_type=jnp.float32) + b1_ref[...]
    h = jnp.maximum(h, 0.0)
    out_ref[...] = jnp.dot(w2_ref[...], h.astype(jnp.bfloat16),
                           preferred_element_type=jnp.float32) + b2_ref[...]


# ------------------------------- wrapper -----------------------------------
def _round_up(x, m):
    return ((x + m - 1) // m) * m


def modal_attention_fusion_forward(x, mask, params, block_b=2048):
    """x: (M, B, F) stacked modal inputs; mask: (M, B, 1) float {0,1} missing."""
    n_modal, batch, f = x.shape
    d = params["wp"].shape[-1]
    o = params["w2"].shape[-1]

    # ---- batch tiling: batch sits on the 128-lane axis --------------------
    b_ceil = _round_up(batch, 128)
    tb = max(128, min(_round_up(block_b, 128), b_ceil))
    if b_ceil >= 256:            # keep >= 2 grid steps when possible (v7x megacore)
        tb = min(tb, _round_up(b_ceil // 2, 128))
    b_pad = _round_up(batch, tb)

    # ---- wrapper-side packing (layout plumbing, done once) ----------------
    # x^T with an appended ones row (folds every bias into the matmul).
    x_t = jnp.transpose(x, (0, 2, 1)).reshape(n_modal * f, batch)          # (M*F, B)
    x_aug = jnp.concatenate([x_t, jnp.ones((1, batch), x_t.dtype)], axis=0)
    mask_t = mask[..., 0].astype(jnp.float32)                              # (M, B)
    if b_pad != batch:
        x_aug = jnp.pad(x_aug, ((0, 0), (0, b_pad - batch)))
        mask_t = jnp.pad(mask_t, ((0, 0), (0, b_pad - batch)))
    x_aug = x_aug.astype(jnp.bfloat16)

    n_rows = n_modal * d + n_modal       # M*D data rows + M score rows
    n_k = n_modal * f + 1                # M*F features + ones row
    w_t = jnp.zeros((n_rows, n_k), jnp.float32)
    for m in range(n_modal):
        wp, bp = params["wp"][m], params["bp"][m]          # (F, D), (1, D)
        wa, ba = params["wa"][m], params["ba"][m]          # (1, D), (1, 1)
        w_t = w_t.at[m * d:(m + 1) * d, m * f:(m + 1) * f].set(wp.T)
        w_t = w_t.at[m * d:(m + 1) * d, n_modal * f].set(bp[0])
        # (x @ Wp + bp) . wa + ba  ==  x @ (Wp . wa)  +  (bp . wa + ba)
        w_t = w_t.at[n_modal * d + m, m * f:(m + 1) * f].set(
            jnp.sum(wp * wa, axis=-1))
        w_t = w_t.at[n_modal * d + m, n_modal * f].set(jnp.sum(bp * wa) + ba[0, 0])
    w_t = w_t.astype(jnp.bfloat16)

    # Fold LayerNorm affine (gamma, beta) into the head's first Linear.
    gamma, beta = params["gamma"], params["beta"]                           # (1, D)
    w1g_t = (params["w1"] * gamma[0][:, None]).T.astype(jnp.bfloat16)       # (D, D)
    b1p_t = (params["b1"] + beta @ params["w1"]).T.astype(jnp.float32)      # (D, 1)
    w2_t = params["w2"].T.astype(jnp.bfloat16)                              # (O, D)
    b2_t = params["b2"].T.astype(jnp.float32)                               # (O, 1)

    in_specs = [
        pl.BlockSpec((n_k, tb), lambda i: (0, i)),         # x_aug (streamed)
        pl.BlockSpec((n_modal, tb), lambda i: (0, i)),     # mask  (streamed)
        pl.BlockSpec((n_rows, n_k), lambda i: (0, 0)),     # W_big^T (resident)
        pl.BlockSpec((d, d), lambda i: (0, 0)),            # w1 (LN folded)
        pl.BlockSpec((d, 1), lambda i: (0, 0)),            # b1
        pl.BlockSpec((o, d), lambda i: (0, 0)),            # w2
        pl.BlockSpec((o, 1), lambda i: (0, 0)),            # b2
    ]

    out_t = pl.pallas_call(
        fusion_kernel,
        out_shape=jax.ShapeDtypeStruct((o, b_pad), jnp.float32),
        grid=(b_pad // tb,),
        in_specs=in_specs,
        out_specs=pl.BlockSpec((o, tb), lambda i: (0, i)),
        compiler_params=pltpu.CompilerParams(
            dimension_semantics=("parallel",),
            vmem_limit_bytes=32 * 1024 * 1024),
    )(x_aug, mask_t, w_t, w1g_t, b1p_t, w2_t, b2_t)
    return out_t[:, :batch].T                                               # (B, O)


# ------------------------------ pure-JAX ref -------------------------------
def reference_forward(x, missing_index, params):
    datas, scores = [], []
    for m, modal in enumerate(MODALITY_TYPES):
        miss = (missing_index == MISSING_TYPE_INDEX[modal])[:, None]        # (B,1)
        data = x[m] @ params["wp"][m] + params["bp"][m]                     # (B,D)
        data = jnp.where(miss, 0.0, data)
        sc = jnp.sum(data * params["wa"][m], axis=-1, keepdims=True) + params["ba"][m]
        sc = jnp.where(miss, -jnp.inf, sc)
        datas.append(data)
        scores.append(sc)
    all_scores = jnp.concatenate(scores, axis=1)                            # (B,M)
    w = jax.nn.softmax(all_scores, axis=1)                                  # (B,M)
    feats = jnp.stack(datas, axis=1)                                        # (B,M,D)
    fused = jnp.sum(feats * w[..., None], axis=1)                           # (B,D)
    mean = jnp.mean(fused, axis=-1, keepdims=True)
    var = jnp.mean((fused - mean) ** 2, axis=-1, keepdims=True)
    normed = (fused - mean) / jnp.sqrt(var + LN_EPS)
    normed = normed * params["gamma"] + params["beta"]
    h = jnp.maximum(normed @ params["w1"] + params["b1"], 0.0)
    return h @ params["w2"] + params["b2"]


# --------------------------------- main ------------------------------------
if __name__ == "__main__":
    key = jax.random.PRNGKey(0)
    keys = jax.random.split(key, 20)

    params = {
        "wp": jax.random.normal(keys[0], (M, FEATURE_DIMS, FUSION_DIM), jnp.float32) * 0.1,
        "bp": jax.random.normal(keys[1], (M, 1, FUSION_DIM), jnp.float32) * 0.05,
        "wa": jax.random.normal(keys[2], (M, 1, FUSION_DIM), jnp.float32) * 0.1,
        "ba": jax.random.normal(keys[3], (M, 1, 1), jnp.float32) * 0.05,
        # non-trivial affine so the LayerNorm-fold into w1/b1 is actually tested
        "gamma": 1.0 + 0.1 * jax.random.normal(keys[15], (1, FUSION_DIM), jnp.float32),
        "beta": 0.05 * jax.random.normal(keys[16], (1, FUSION_DIM), jnp.float32),
        "w1": jax.random.normal(keys[4], (FUSION_DIM, FUSION_DIM), jnp.float32) * 0.1,
        "b1": jax.random.normal(keys[5], (1, FUSION_DIM), jnp.float32) * 0.05,
        "w2": jax.random.normal(keys[6], (FUSION_DIM, OUTPUT_DIMS), jnp.float32) * 0.1,
        "b2": jax.random.normal(keys[7], (1, OUTPUT_DIMS), jnp.float32) * 0.05,
    }

    # bf16 MXU operands (f32 accumulation) vs. the f32 reference:
    TOL = dict(atol=3e-2, rtol=3e-2)

    # ---- test 1: B = 8, single batch tile ---------------------------------
    batch = {
        modal: jax.random.normal(keys[8 + i], (B, FEATURE_DIMS), jnp.float32)
        for i, modal in enumerate(MODALITY_TYPES)
    }
    x = jnp.stack([batch[m] for m in MODALITY_TYPES], axis=0)               # (M, B, F)
    missing_index = jax.random.randint(keys[12], (B,), 0, 4, jnp.int32)
    mask = jnp.stack(
        [(missing_index == MISSING_TYPE_INDEX[m]).astype(jnp.float32)
         for m in MODALITY_TYPES], axis=0)[..., None]                       # (M, B, 1)

    out = jax.block_until_ready(modal_attention_fusion_forward(x, mask, params))
    ref = reference_forward(x, missing_index, params)
    assert out.shape == (B, OUTPUT_DIMS)
    assert jnp.allclose(out, ref, **TOL), (jnp.max(jnp.abs(out - ref)), out, ref)

    # ---- test 2: multi-tile batch grid (B = 300 -> tb = 256, grid = (2,)) --
    B2 = 300
    x2 = jax.random.normal(keys[13], (M, B2, FEATURE_DIMS), jnp.float32)
    mi2 = jax.random.randint(keys[14], (B2,), 0, 4, jnp.int32)
    mask2 = jnp.stack(
        [(mi2 == MISSING_TYPE_INDEX[m]).astype(jnp.float32)
         for m in MODALITY_TYPES], axis=0)[..., None]
    out2 = jax.block_until_ready(modal_attention_fusion_forward(x2, mask2, params))
    ref2 = reference_forward(x2, mi2, params)
    assert out2.shape == (B2, OUTPUT_DIMS)
    assert jnp.allclose(out2, ref2, **TOL), (jnp.max(jnp.abs(out2 - ref2)),)

    print("KERNEL_OK")
</pallas_src>

<mosaic_0001>
module attributes {stable_mosaic.version = 11 : i64} {
  func.func @fusion_kernel(%arg0: i32, %arg1: memref<97x128xbf16, #tpu.memory_space<vmem>>, %arg2: memref<3x128xf32, #tpu.memory_space<vmem>>, %arg3: memref<99x97xbf16, #tpu.memory_space<vmem>>, %arg4: memref<32x32xbf16, #tpu.memory_space<vmem>>, %arg5: memref<32x1xf32, #tpu.memory_space<vmem>>, %arg6: memref<8x32xbf16, #tpu.memory_space<vmem>>, %arg7: memref<8x1xf32, #tpu.memory_space<vmem>>, %arg8: memref<8x128xf32, #tpu.memory_space<vmem>>) attributes {dimension_semantics = [#tpu.dimension_semantics<parallel>], iteration_bounds = array<i64: 1>, scalar_prefetch = 0 : i64, scratch_operands = 0 : i64, tpu.core_type = #tpu.core_type<tc>, window_params = [{transform_indices = @transform_0, window_bounds = array<i64: 97, 128>}, {transform_indices = @transform_1, window_bounds = array<i64: 3, 128>}, {pipeline_mode = #tpu.pipeline_mode<synchronous>, transform_indices = @transform_2, window_bounds = array<i64: 99, 97>}, {pipeline_mode = #tpu.pipeline_mode<synchronous>, transform_indices = @transform_3, window_bounds = array<i64: 32, 32>}, {pipeline_mode = #tpu.pipeline_mode<synchronous>, transform_indices = @transform_4, window_bounds = array<i64: 32, 1>}, {pipeline_mode = #tpu.pipeline_mode<synchronous>, transform_indices = @transform_5, window_bounds = array<i64: 8, 32>}, {pipeline_mode = #tpu.pipeline_mode<synchronous>, transform_indices = @transform_6, window_bounds = array<i64: 8, 1>}, {transform_indices = @transform_7, window_bounds = array<i64: 8, 128>}]} {
    %c0 = arith.constant 0 : index
    %c0_0 = arith.constant 0 : index
    %0 = vector.load %arg3[%c0, %c0_0] : memref<99x97xbf16, #tpu.memory_space<vmem>>, vector<99x97xbf16>
    %c0_1 = arith.constant 0 : index
    %c0_2 = arith.constant 0 : index
    %1 = vector.load %arg1[%c0_1, %c0_2] : memref<97x128xbf16, #tpu.memory_space<vmem>>, vector<97x128xbf16>
    %cst = arith.constant dense<0.000000e+00> : vector<99x128xf32>
    %2 = tpu.matmul %0, %1, %cst {dimension_numbers = #tpu.dot_dimension_numbers<[1], [0], [0], [1], [0, 0, 1, 1], [], []>} : vector<99x97xbf16>, vector<97x128xbf16>, vector<99x128xf32> -> vector<99x128xf32>
    %3 = vector.extract_strided_slice %2 {offsets = [96, 0], sizes = [1, 128], strides = [1, 1]} : vector<99x128xf32> to vector<1x128xf32>
    %c0_3 = arith.constant 0 : index
    %c0_4 = arith.constant 0 : index
    %4 = vector.load %arg2[%c0_3, %c0_4] : memref<3x128xf32, #tpu.memory_space<vmem>>, vector<1x128xf32>
    %cst_5 = arith.constant 0.000000e+00 : f32
    %5 = vector.broadcast %cst_5 : f32 to vector<1x128xf32>
    %6 = arith.cmpf ogt, %4, %5 : vector<1x128xf32>
    %cst_6 = arith.constant 0xFF800000 : f32
    %7 = vector.broadcast %cst_6 : f32 to vector<1x128xf32>
    %8 = arith.select %6, %7, %3 : vector<1x128xi1>, vector<1x128xf32>
    %9 = vector.extract_strided_slice %2 {offsets = [97, 0], sizes = [1, 128], strides = [1, 1]} : vector<99x128xf32> to vector<1x128xf32>
    %c1 = arith.constant 1 : index
    %c0_7 = arith.constant 0 : index
    %10 = vector.load %arg2[%c1, %c0_7] : memref<3x128xf32, #tpu.memory_space<vmem>>, vector<1x128xf32>
    %cst_8 = arith.constant 0.000000e+00 : f32
    %11 = vector.broadcast %cst_8 : f32 to vector<1x128xf32>
    %12 = arith.cmpf ogt, %10, %11 : vector<1x128xf32>
    %cst_9 = arith.constant 0xFF800000 : f32
    %13 = vector.broadcast %cst_9 : f32 to vector<1x128xf32>
    %14 = arith.select %12, %13, %9 : vector<1x128xi1>, vector<1x128xf32>
    %15 = vector.extract_strided_slice %2 {offsets = [98, 0], sizes = [1, 128], strides = [1, 1]} : vector<99x128xf32> to vector<1x128xf32>
    %c2 = arith.constant 2 : index
    %c0_10 = arith.constant 0 : index
    %16 = vector.load %arg2[%c2, %c0_10] : memref<3x128xf32, #tpu.memory_space<vmem>>, vector<1x128xf32>
    %cst_11 = arith.constant 0.000000e+00 : f32
    %17 = vector.broadcast %cst_11 : f32 to vector<1x128xf32>
    %18 = arith.cmpf ogt, %16, %17 : vector<1x128xf32>
    %cst_12 = arith.constant 0xFF800000 : f32
    %19 = vector.broadcast %cst_12 : f32 to vector<1x128xf32>
    %20 = arith.select %18, %19, %15 : vector<1x128xi1>, vector<1x128xf32>
    %21 = arith.maximumf %8, %14 : vector<1x128xf32>
    %22 = arith.maximumf %21, %20 : vector<1x128xf32>
    %23 = arith.subf %8, %22 : vector<1x128xf32>
    %24 = math.exp %23 : vector<1x128xf32>
    %25 = arith.subf %14, %22 : vector<1x128xf32>
    %26 = math.exp %25 : vector<1x128xf32>
    %27 = arith.subf %20, %22 : vector<1x128xf32>
    %28 = math.exp %27 : vector<1x128xf32>
    %29 = arith.addf %24, %26 : vector<1x128xf32>
    %30 = arith.addf %29, %28 : vector<1x128xf32>
    %31 = tpu.reciprocal %30 {approx = true} : vector<1x128xf32> -> vector<1x128xf32>
    %32 = arith.mulf %24, %31 : vector<1x128xf32>
    %33 = vector.extract_strided_slice %2 {offsets = [0, 0], sizes = [32, 128], strides = [1, 1]} : vector<99x128xf32> to vector<32x128xf32>
    %34 = vector.broadcast %32 : vector<1x128xf32> to vector<32x128xf32>
    %35 = arith.mulf %34, %33 : vector<32x128xf32>
    %36 = arith.mulf %26, %31 : vector<1x128xf32>
    %37 = vector.extract_strided_slice %2 {offsets = [32, 0], sizes = [32, 128], strides = [1, 1]} : vector<99x128xf32> to vector<32x128xf32>
    %38 = vector.broadcast %36 : vector<1x128xf32> to vector<32x128xf32>
    %39 = arith.mulf %38, %37 : vector<32x128xf32>
    %40 = arith.addf %35, %39 : vector<32x128xf32>
    %41 = arith.mulf %28, %31 : vector<1x128xf32>
    %42 = vector.extract_strided_slice %2 {offsets = [64, 0], sizes = [32, 128], strides = [1, 1]} : vector<99x128xf32> to vector<32x128xf32>
    %43 = vector.broadcast %41 : vector<1x128xf32> to vector<32x128xf32>
    %44 = arith.mulf %43, %42 : vector<32x128xf32>
    %45 = arith.addf %40, %44 : vector<32x128xf32>
    %cst_13 = arith.constant dense<0.000000e+00> : vector<128xf32>
    %46 = vector.multi_reduction <add>, %45, %cst_13 [0] : vector<32x128xf32> to vector<128xf32>
    %47 = vector.shape_cast %46 : vector<128xf32> to vector<1x128xf32>
    %cst_14 = arith.constant 3.200000e+01 : f32
    %48 = vector.broadcast %cst_14 : f32 to vector<1x128xf32>
    %49 = arith.divf %47, %48 : vector<1x128xf32>
    %50 = vector.broadcast %49 : vector<1x128xf32> to vector<32x128xf32>
    %51 = arith.subf %45, %50 : vector<32x128xf32>
    %52 = arith.mulf %51, %51 : vector<32x128xf32>
    %cst_15 = arith.constant dense<0.000000e+00> : vector<128xf32>
    %53 = vector.multi_reduction <add>, %52, %cst_15 [0] : vector<32x128xf32> to vector<128xf32>
    %54 = vector.shape_cast %53 : vector<128xf32> to vector<1x128xf32>
    %cst_16 = arith.constant 3.200000e+01 : f32
    %55 = vector.broadcast %cst_16 : f32 to vector<1x128xf32>
    %56 = arith.divf %54, %55 : vector<1x128xf32>
    %57 = vector.broadcast %49 : vector<1x128xf32> to vector<32x128xf32>
    %58 = arith.subf %45, %57 : vector<32x128xf32>
    %cst_17 = arith.constant 9.99999974E-6 : f32
    %59 = vector.broadcast %cst_17 : f32 to vector<1x128xf32>
    %60 = arith.addf %56, %59 : vector<1x128xf32>
    %61 = math.rsqrt %60 : vector<1x128xf32>
    %62 = vector.broadcast %61 : vector<1x128xf32> to vector<32x128xf32>
    %63 = arith.mulf %58, %62 : vector<32x128xf32>
    %c0_18 = arith.constant 0 : index
    %c0_19 = arith.constant 0 : index
    %64 = vector.load %arg4[%c0_18, %c0_19] : memref<32x32xbf16, #tpu.memory_space<vmem>>, vector<32x32xbf16>
    %65 = arith.truncf %63 : vector<32x128xf32> to vector<32x128xbf16>
    %cst_20 = arith.constant dense<0.000000e+00> : vector<32x128xf32>
    %66 = tpu.matmul %64, %65, %cst_20 {dimension_numbers = #tpu.dot_dimension_numbers<[1], [0], [0], [1], [0, 0, 1, 1], [], []>} : vector<32x32xbf16>, vector<32x128xbf16>, vector<32x128xf32> -> vector<32x128xf32>
    %c0_21 = arith.constant 0 : index
    %c0_22 = arith.constant 0 : index
    %67 = vector.load %arg5[%c0_21, %c0_22] : memref<32x1xf32, #tpu.memory_space<vmem>>, vector<32x1xf32>
    %68 = vector.broadcast %67 : vector<32x1xf32> to vector<32x128xf32>
    %69 = arith.addf %66, %68 : vector<32x128xf32>
    %cst_23 = arith.constant 0.000000e+00 : f32
    %70 = vector.broadcast %cst_23 : f32 to vector<32x128xf32>
    %71 = arith.maximumf %69, %70 : vector<32x128xf32>
    %c0_24 = arith.constant 0 : index
    %c0_25 = arith.constant 0 : index
    %72 = vector.load %arg6[%c0_24, %c0_25] : memref<8x32xbf16, #tpu.memory_space<vmem>>, vector<8x32xbf16>
    %73 = arith.truncf %71 : vector<32x128xf32> to vector<32x128xbf16>
    %cst_26 = arith.constant dense<0.000000e+00> : vector<8x128xf32>
    %74 = tpu.matmul %72, %73, %cst_26 {dimension_numbers = #tpu.dot_dimension_numbers<[1], [0], [0], [1], [0, 0, 1, 1], [], []>} : vector<8x32xbf16>, vector<32x128xbf16>, vector<8x128xf32> -> vector<8x128xf32>
    %c0_27 = arith.constant 0 : index
    %c0_28 = arith.constant 0 : index
    %75 = vector.load %arg7[%c0_27, %c0_28] : memref<8x1xf32, #tpu.memory_space<vmem>>, vector<8x1xf32>
    %76 = vector.broadcast %75 : vector<8x1xf32> to vector<8x128xf32>
    %77 = arith.addf %74, %76 : vector<8x128xf32>
    %c0_29 = arith.constant 0 : index
    %c0_30 = arith.constant 0 : index
    %78 = vector.load %arg8[%c0_29, %c0_30] : memref<8x128xf32, #tpu.memory_space<vmem>>, vector<8x128xf32>
    tpu.vector_store %arg8[%c0_29, %c0_30], %77 {strides = array<i32>} : memref<8x128xf32, #tpu.memory_space<vmem>>, vector<8x128xf32>,
    return
  }
  func.func @transform_0(%arg0: i32) -> (i32, i32) {
    %c0_i32 = arith.constant 0 : i32
    %c0_i32_0 = arith.constant 0 : i32
    return %c0_i32, %arg0 : i32, i32
  }
  func.func @transform_1(%arg0: i32) -> (i32, i32) {
    %c0_i32 = arith.constant 0 : i32
    %c0_i32_0 = arith.constant 0 : i32
    return %c0_i32, %arg0 : i32, i32
  }
  func.func @transform_2(%arg0: i32) -> (i32, i32) {
    %c0_i32 = arith.constant 0 : i32
    %c0_i32_0 = arith.constant 0 : i32
    %c0_i32_1 = arith.constant 0 : i32
    return %c0_i32, %c0_i32_0 : i32, i32
  }
  func.func @transform_3(%arg0: i32) -> (i32, i32) {
    %c0_i32 = arith.constant 0 : i32
    %c0_i32_0 = arith.constant 0 : i32
    %c0_i32_1 = arith.constant 0 : i32
    return %c0_i32, %c0_i32_0 : i32, i32
  }
  func.func @transform_4(%arg0: i32) -> (i32, i32) {
    %c0_i32 = arith.constant 0 : i32
    %c0_i32_0 = arith.constant 0 : i32
    %c0_i32_1 = arith.constant 0 : i32
    return %c0_i32, %c0_i32_0 : i32, i32
  }
  func.func @transform_5(%arg0: i32) -> (i32, i32) {
    %c0_i32 = arith.constant 0 : i32
    %c0_i32_0 = arith.constant 0 : i32
    %c0_i32_1 = arith.constant 0 : i32
    return %c0_i32, %c0_i32_0 : i32, i32
  }
  func.func @transform_6(%arg0: i32) -> (i32, i32) {
    %c0_i32 = arith.constant 0 : i32
    %c0_i32_0 = arith.constant 0 : i32
    %c0_i32_1 = arith.constant 0 : i32
    return %c0_i32, %c0_i32_0 : i32, i32
  }
  func.func @transform_7(%arg0: i32) -> (i32, i32) {
    %c0_i32 = arith.constant 0 : i32
    %c0_i32_0 = arith.constant 0 : i32
    return %c0_i32, %arg0 : i32, i32
  }
}

</mosaic_0001>

<bundles_post_ra>
// kernel: tpu_custom_call.1
= control target key start
LH: loop header
LB: loop body
LE: loop exit
PB: predicated region body
PF: predicated region fallthrough
CT: control target
= control target key end

     0   :  { %12 = vsyncpa [#allocation3], 0  ;;  %s746_s0 = inlined_call_operand.hbm [shape: bf16[97,128], index: 0, kind: input, shape index: {}]   ;;  %s747_s1 = inlined_call_operand.vmem [shape: f32[3,128], index: 1, kind: input, shape index: {}]   ;;  %s748_s2 = inlined_call_operand.hbm [shape: bf16[99,97], index: 2, kind: input, shape index: {}]   ;;  %s749_s3 = inlined_call_operand.vmem [shape: bf16[32,32], index: 3, kind: input, shape index: {}]   ;;  %s750_s4 = inlined_call_operand.vmem [shape: f32[32,1], index: 4, kind: input, shape index: {}]   ;;  %s751_s5 = inlined_call_operand.vmem [shape: bf16[8,32], index: 5, kind: input, shape index: {}]   ;;  %s752_s6 = inlined_call_operand.vmem [shape: f32[8,1], index: 6, kind: input, shape index: {}]   ;;  %s753_s7 = inlined_call_operand.hbm [shape: f32[8,128], index: 7, kind: output, shape index: {}]  }
   0x1   :  { %13 = vsyncpa [#allocation6], 0 }
   0x2   :  { %14 = vsyncpa [#allocation4], 0  ;;  %s19_s26 = sshll.u32 %s746_s0, 4  ;;  %s641_s27 = smov [#allocation2]   ;;  %s20_s26 = int_to_ptr.hbm [resolvable:$true] %s19_s26 }
   0x3   :  { %s21_s28 = sshll.u32 %s641_s27, 4  ;;  %s34_s8 = sshll.u32 %s748_s2, 4  ;;  %s22_s28 = int_to_ptr.vmem [resolvable:$true] %s21_s28  ;;  %s35_s8 = int_to_ptr.hbm [resolvable:$true] %s34_s8 }
   0x4   :  { %s642_s9 = smov 64   ;;  %s643_s10 = smov 4  }
   0x5   :  { %27 = dma.hbm_to_vmem [thread:$0]  %s20_s26, 832, %s22_s28, [#allocation3], %s642_s9, %s642_s9, %s643_s10  }
   0x6   :  { %s644_s11 = smov [#allocation5]  }
   0x7   :  { %s36_s12 = sshll.u32 %s644_s11, 4  ;;  %s37_s12 = int_to_ptr.vmem [resolvable:$true] %s36_s12 }
   0x8   :  { %42 = dma.hbm_to_vmem [thread:$0]  %s35_s8, 832, %s37_s12, [#allocation6], %s642_s9, %s642_s9, %s643_s10  }
   0x9   :  { %635 = dma.done.wait [#allocation3], 832  }
   0xa   :  { %636 = vsyncadd [#allocation3], 4294966464 }
   0xb   :  { %637 = dma.done.wait [#allocation6], 832  }
   0xc   :  { %638 = vsyncadd [#allocation6], 4294966464  ;;  %v645_v0 = vmov 0   ;;  %vm180_vm0 = vcmask 1040384   ;;  %v85_v1 = vld [vmem:[#allocation2 + $0x30] sm:$0x1] }
   0xd   :  { %549 = vset.pattern.permute.xlu1 %v645_v0  ;;  %548 = vset.pattern.permute.xlu0 %v645_v0  ;;  %v144_v2 = vunpack.c.l.b16 %v85_v1  ;;  %v182_v3 = vsel %vm180_vm0, 65535, %v645_v0  ;;  %v524_v6 = vld [vmem:[#allocation2 + $0x28] sm:$0xff]  ;;  %v523_v7 = vld [vmem:[#allocation2 + $0x20] sm:$0xff]  ;;  %v522_v8 = vld [vmem:[#allocation2 + $0x18] sm:$0xff]  ;;  %vm158_vm1 = vcmask 793600   ;;  %v646_v58 = vmov 32.0  }
   0xe   :  { %550 = vset.pattern.permute.xlu2 %v645_v0  ;;  %v521_v9 = vld [vmem:[#allocation2 + $0x10] sm:$0xff]  ;;  %v520_v10 = vld [vmem:[#allocation2 + $0x8] sm:$0xff]  ;;  %v519_v11 = vld [vmem:[#allocation2] sm:$0xff]  ;;  %vm373_vm9 = vcmask 261120   ;;  %s647_s29 = smov [#allocation7]   ;;  %s436_s10 = sshll.u32 %s753_s7, 4  ;;  %s437_s10 = int_to_ptr.hbm [resolvable:$true] %s436_s10 }
   0xf   :  { %v151_v4 = vpack.c.b16 %v144_v2, %v144_v2  ;;  %v517_v12 = vld [vmem:[#allocation5 + $0x20] sm:$0xff]  ;;  %v515_v13 = vld [vmem:[#allocation5 + $0x10] sm:$0xff]  ;;  %v518_v15 = vld [vmem:[#allocation5 + $0x28] sm:$0xff]  ;;  %s434_s30 = sshll.u32 %s647_s29, 4  ;;  %s435_s30 = int_to_ptr.vmem [resolvable:$true] %s434_s30 }
  0x10   :  { %v513_v14 = vld [vmem:[#allocation5] sm:$0xff]  ;;  %v516_v16 = vld [vmem:[#allocation5 + $0x18] sm:$0xff]  ;;  %v514_v17 = vld [vmem:[#allocation5 + $0x8] sm:$0xff] }
  0x11   :  { %v184_v5 = vand.u32 %v182_v3, %v151_v4  ;;  %v72_v18 = vld [vmem:[#allocation5 + $0x30] sm:$0x3]  ;;  %v229_v25 = vld [vmem:[%s747_s1] sm:$0x1]  ;;  %v232_v26 = vld [vmem:[%s747_s1 + $0x1] sm:$0x1] }
  0x12   :  { %v111_v19 = vunpack.c.l.b16 %v72_v18  ;;  %v238_v27 = vld [vmem:[%s747_s1 + $0x2] sm:$0x1]  ;;  %vm230_vm2 = vcmp.gt.f32.partialorder %v229_v25, 0.0  ;;  %vm233_vm3 = vcmp.gt.f32.partialorder %v232_v26, 0.0 }
  0x13   :  { %528 = vmatpush.bf16.msra.mxu3 %v184_v5  ;;  %527 = vmatpush.bf16.msra.mxu2 %v184_v5  ;;  %vm239_vm4 = vcmp.gt.f32.partialorder %v238_v27, 0.0 }
  0x14   :  { %187 = vmatpush.bf16.msra.mxu0 %v184_v5  ;;  %v118_v20 = vpack.c.b16 %v111_v19, %v111_v19 }
  0x17   :  { %530 = vmatpush.bf16.msra.mxu3 %v524_v6  ;;  %529 = vmatpush.bf16.msra.mxu2 %v524_v6 }
  0x18   :  { %188 = vmatpush.bf16.msra.mxu0 %v524_v6 }
  0x1b   :  { %532 = vmatpush.bf16.msra.mxu3 %v523_v7  ;;  %531 = vmatpush.bf16.msra.mxu2 %v523_v7 }
  0x1c   :  { %189 = vmatpush.bf16.msra.mxu0 %v523_v7 }
  0x1f   :  { %534 = vmatpush.bf16.msra.mxu3 %v522_v8  ;;  %533 = vmatpush.bf16.msra.mxu2 %v522_v8 }
  0x20   :  { %190 = vmatpush.bf16.msra.mxu0 %v522_v8 }
  0x23   :  { %536 = vmatpush.bf16.msra.mxu3 %v521_v9  ;;  %535 = vmatpush.bf16.msra.mxu2 %v521_v9 }
  0x24   :  { %191 = vmatpush.bf16.msra.mxu0 %v521_v9 }
  0x27   :  { %538 = vmatpush.bf16.msra.mxu3 %v520_v10  ;;  %537 = vmatpush.bf16.msra.mxu2 %v520_v10 }
  0x28   :  { %192 = vmatpush.bf16.msra.mxu0 %v520_v10 }
  0x2b   :  { %540 = vmatpush.bf16.msra.mxu3 %v519_v11  ;;  %539 = vmatpush.bf16.msra.mxu2 %v519_v11 }
  0x2c   :  { %193 = vmatpush.bf16.msra.mxu0 %v519_v11 }
  0x2e   :  { %499 = vmatmul.msk.bf16.vlgmr.msra.gmra.mxu3 %vm158_vm1, %v517_v12  ;;  %497 = vmatmul.msk.bf16.vlgmr.msra.gmra.mxu2 %vm158_vm1, %v515_v13 }
  0x2f   :  { %495 = vmatmul.msk.bf16.vlgmr.msra.gmra.mxu0 %vm158_vm1, %v513_v14 }
  0x3e   :  { %500 = vmatmul.msk.bf16.gmra.mxu3 %vm158_vm1, %v518_v15  ;;  %498 = vmatmul.msk.bf16.gmra.mxu2 %vm158_vm1, %v516_v16 }
  0x3f   :  { %496 = vmatmul.msk.bf16.gmra.mxu0 %vm158_vm1, %v514_v17 }
  0x4e   :  { %501 = vmatmul.msk.bf16.gmra.mxu3 %vm158_vm1, %v118_v20 }
  0xac   :  { %v195_v36 = vpop.f32.mrf.mxu0 }
  0xb1   :  { %v215_v21 = vpop.f32.mrf.mxu3  ;;  %v205_v37 = vpop.f32.mrf.mxu2 }
  0xb4   :  { %v197_v45 = vpop.f32.mrf.mxu0 }
  0xb9   :  { %v217_v22 = vpop.f32.mrf.mxu3  ;;  %v207_v46 = vpop.f32.mrf.mxu2 }
  0xbc   :  { %v200_v52 = vpop.f32.mrf.mxu0 }
  0xc1   :  { %v701_v23 = vpop.f32.mrf.mxu3  ;;  %v210_v53 = vpop.f32.mrf.mxu2 }
  0xc4   :  { %v202_v4 = vpop.f32.mrf.mxu0 }
  0xc9   :  { %v703_v24 = vpop.f32.mrf.mxu3  ;;  %v212_v5 = vpop.f32.mrf.mxu2 }
  0xd1   :  { %v225_v28 = vpop.f32.mrf.mxu3 }
  0xd2   :  { %v235_v29 = vrot.slane %v225_v28, 1  ;;  %v240_v30 = vrot.slane %v225_v28, 2  ;;  %v231_v31 = vsel %vm230_vm2, -inf, %v225_v28 }
  0xd4   :  { %v237_v32 = vsel %vm233_vm3, -inf, %v235_v29  ;;  %v242_v34 = vsel %vm239_vm4, -inf, %v240_v30 }
  0xd5   :  { %v243_v33 = vmax.f32 %v231_v31, %v237_v32 }
  0xd7   :  { %v244_v35 = vmax.f32 %v243_v33, %v242_v34 }
  0xd9   :  { %v245_v38 = vsub.f32 %v231_v31, %v244_v35  ;;  %v248_v39 = vsub.f32 %v237_v32, %v244_v35  ;;  %v251_v40 = vsub.f32 %v242_v34, %v244_v35  ;;  %v227_v41 = vpop.f32.mrf.mxu3 }
  0xdb   :  { %v246_v42 = vmul.f32 1.442695, %v245_v38  ;;  %v249_v43 = vmul.f32 1.442695, %v248_v39  ;;  %v252_v44 = vmul.f32 1.442695, %v251_v40 }
  0xdd   :  { %551 = vpow2.f32 %v246_v42 }
  0xde   :  { %553 = vpow2.f32 %v249_v43 }
  0xdf   :  { %555 = vpow2.f32 %v252_v44 }
  0xe3   :  { %v552_v47 = vpop.eup %551 }
  0xe4   :  { %v554_v48 = vpop.eup %553 }
  0xe5   :  { %v254_v49 = vadd.f32 %v554_v48, %v552_v47  ;;  %v556_v50 = vpop.eup %555 }
  0xe7   :  { %v255_v51 = vadd.f32 %v556_v50, %v254_v49 }
  0xe9   :  { %557 = vrcp.f32 %v255_v51 }
  0xea   :  { %559 = vrcp.f32 %v646_v58 }
  0xef   :  { %v558_v54 = vpop.eup %557 }
  0xf0   :  { %v273_v55 = vmul.f32 %v558_v54, %v556_v50  ;;  %v257_v56 = vmul.f32 %v558_v54, %v552_v47  ;;  %v263_v57 = vmul.f32 %v558_v54, %v554_v48  ;;  %v560_v10 = vpop.eup %559  ;;  %v339_v54 = vld [vmem:[%s750_s4] sm:$0xff] }
  0xf1   :  { %v293_v18 = vmul.f32 32.0, %v560_v10  ;;  %vm297_vm5 = vweird.f32 %v560_v10  ;;  %345 = vperm.xlu1 %549, %v339_v54  }
  0xf2   :  { %v258_v59 = vperm.slane %v257_v56, 0  ;;  %v264_v60 = vperm.slane %v263_v57, 0  ;;  %v274_v61 = vperm.slane %v273_v55, 0 }
  0xf3   :  { %v294_v28 = vsub.f32 1.0, %v293_v18 }
  0xf4   :  { %v259_v62 = vmul.f32 %v258_v59, %v195_v36  ;;  %v265_v63 = vmul.f32 %v264_v60, %v205_v37  ;;  %v260_v0 = vmul.f32 %v258_v59, %v197_v45  ;;  %v266_v1 = vmul.f32 %v264_v60, %v207_v46 }
  0xf5   :  { %v261_v2 = vmul.f32 %v258_v59, %v200_v52  ;;  %v267_v3 = vmul.f32 %v264_v60, %v210_v53  ;;  %v275_v7 = vmul.f32 %v274_v61, %v215_v21  ;;  %v262_v8 = vmul.f32 %v258_v59, %v202_v4 }
  0xf6   :  { %v269_v6 = vadd.f32 %v265_v63, %v259_v62  ;;  %v268_v9 = vmul.f32 %v264_v60, %v212_v5  ;;  %v270_v11 = vadd.f32 %v266_v1, %v260_v0  ;;  %v276_v12 = vmul.f32 %v274_v61, %v217_v22  ;;  %v340_v62 = vld [vmem:[%s750_s4 + $0x8] sm:$0xff] }
  0xf7   :  { %v271_v13 = vadd.f32 %v267_v3, %v261_v2  ;;  %v277_v16 = vmul.f32 %v274_v61, %v701_v23  ;;  %v278_v25 = vmul.f32 %v274_v61, %v703_v24  ;;  %v295_v30 = vmul.f32 %v560_v10, %v294_v28  ;;  %v341_v61 = vld [vmem:[%s750_s4 + $0x10] sm:$0xff]  ;;  %v342_v3 = vld [vmem:[%s750_s4 + $0x18] sm:$0xff] }
  0xf8   :  { %v279_v14 = vadd.f32 %v275_v7, %v269_v6  ;;  %v280_v15 = vadd.f32 %v276_v12, %v270_v11  ;;  %v272_v17 = vadd.f32 %v268_v9, %v262_v8  ;;  %355 = vperm.xlu0 %548, %v341_v61   ;;  %v525_v8 = vld [vmem:[%s749_s3] sm:$0xff]  ;;  %v526_v9 = vld [vmem:[%s749_s3 + $0x8] sm:$0xff] }
  0xf9   :  { %v281_v20 = vadd.f32 %v277_v16, %v271_v13  ;;  %v296_v22 = vadd.f32 %v560_v10, %v295_v30  ;;  %350 = vperm.xlu1 %549, %v340_v62   ;;  %v406_v11 = vld [vmem:[%s752_s6] sm:$0xff] }
  0xfa   :  { %v283_v19 = vadd.f32 %v280_v15, %v279_v14  ;;  %v282_v27 = vadd.f32 %v278_v25, %v272_v17  ;;  %409 = vperm.xlu2 %550, %v406_v11  }
  0xfb   :  { %v298_v35 = vsel %vm297_vm5, %v560_v10, %v296_v22 }
  0xfc   :  { %v284_v26 = vadd.f32 %v283_v19, %v281_v20 }
  0xfe   :  { %v285_v21 = vadd.f32 %v284_v26, %v282_v27 }
 0x100   :  { %v286_v29 = vrot.slane %v285_v21, 4  ;;  %360 = vperm.xlu0 %548, %v342_v3  }
 0x102   :  { %v287_v31 = vadd.f32 %v286_v29, %v285_v21 }
 0x104   :  { %v288_v32 = vrot.slane %v287_v31, 2 }
 0x106   :  { %v289_v33 = vadd.f32 %v288_v32, %v287_v31  ;;  %v403_v32 = vld [vmem:[%s751_s5] sm:$0xf] }
 0x108   :  { %v290_v34 = vrot.slane %v289_v33, 1 }
 0x10a   :  { %v291_v23 = vadd.f32 %v290_v34, %v289_v33 }
 0x10c   :  { %v299_v36 = vmul.f32 %v298_v35, %v291_v23 }
 0x10e   :  { %v300_v37 = vsub.f32 %v279_v14, %v299_v36  ;;  %v301_v38 = vsub.f32 %v280_v15, %v299_v36  ;;  %v302_v39 = vsub.f32 %v281_v20, %v299_v36  ;;  %v303_v40 = vsub.f32 %v282_v27, %v299_v36 }
 0x110   :  { %v304_v24 = vmul.f32 %v300_v37, %v300_v37  ;;  %v305_v41 = vmul.f32 %v301_v38, %v301_v38  ;;  %v306_v42 = vmul.f32 %v302_v39, %v302_v39  ;;  %v307_v44 = vmul.f32 %v303_v40, %v303_v40 }
 0x112   :  { %v308_v43 = vadd.f32 %v305_v41, %v304_v24 }
 0x114   :  { %v309_v45 = vadd.f32 %v308_v43, %v306_v42 }
 0x116   :  { %v310_v46 = vadd.f32 %v309_v45, %v307_v44 }
 0x118   :  { %v311_v47 = vrot.slane %v310_v46, 4 }
 0x11a   :  { %v312_v48 = vadd.f32 %v311_v47, %v310_v46 }
 0x11c   :  { %v313_v49 = vrot.slane %v312_v48, 2 }
 0x11e   :  { %v314_v50 = vadd.f32 %v313_v49, %v312_v48 }
 0x120   :  { %v315_v51 = vrot.slane %v314_v50, 1 }
 0x122   :  { %v316_v52 = vadd.f32 %v315_v51, %v314_v50 }
 0x124   :  { %v317_v53 = vmul.f32 %v316_v52, %v298_v35 }
 0x126   :  { %v318_v55 = vadd.f32 1e-05, %v317_v53 }
 0x128   :  { %561 = vrsqrt.f32 %v318_v55  ;;  %vm325_vm7 = vweird.f32 %v318_v55 }
 0x12e   :  { %v562_v56 = vpop.eup %561 }
 0x12f   :  { %v320_v57 = vmul.f32 %v562_v56, %v318_v55  ;;  %vm326_vm6 = vweird.f32 %v562_v56 }
 0x130   :  { %vm327_vm8 = vmor %vm325_vm7, %vm326_vm6 }
 0x131   :  { %v321_v58 = vmul.f32 %v562_v56, %v320_v57 }
 0x133   :  { %v322_v59 = vmul.f32 0.5, %v321_v58 }
 0x135   :  { %v323_v60 = vsub.f32 1.5, %v322_v59 }
 0x137   :  { %v324_v63 = vmul.f32 %v562_v56, %v323_v60 }
 0x139   :  { %v328_v0 = vsel %vm327_vm8, %v562_v56, %v324_v63 }
 0x13a   :  { %v331_v1 = vmul.f32 %v328_v0, %v302_v39  ;;  %v332_v2 = vmul.f32 %v328_v0, %v303_v40  ;;  %v329_v5 = vmul.f32 %v328_v0, %v300_v37  ;;  %v330_v6 = vmul.f32 %v328_v0, %v301_v38 }
 0x13c   :  { %v338_v4 = vpack.c.bf16 %v332_v2, %v331_v1  ;;  %v337_v7 = vpack.c.bf16 %v330_v6, %v329_v5 }
 0x13e   :  { %386 = vmatpush.bf16.msra.mxu1 %v338_v4 }
 0x142   :  { %387 = vmatpush.bf16.msra.mxu1 %v337_v7 }
 0x145   :  { %510 = vmatmul.msk.bf16.vlgmr.msra.gmra.mxu1 %vm373_vm9, %v525_v8 }
 0x154   :  { %v410_v22 = vpop.permute.xlu2 %409 }
 0x155   :  { %511 = vmatmul.msk.bf16.gmra.mxu1 %vm373_vm9, %v526_v9 }
 0x163   :  { %v346_v13 = vpop.permute.xlu1 %345 }
 0x16a   :  { %v356_v14 = vpop.permute.xlu0 %355 }
 0x16b   :  { %v351_v16 = vpop.permute.xlu1 %350 }
 0x172   :  { %v361_v18 = vpop.permute.xlu0 %360 }
 0x1c2   :  { %v389_v10 = vpop.f32.mrf.mxu1 }
 0x1c3   :  { %v390_v26 = vadd.f32 %v389_v10, %v346_v13 }
 0x1c5   :  { %v399_v30 = vmax.f32 %v390_v26, 0.0 }
 0x1ca   :  { %v391_v12 = vpop.f32.mrf.mxu1 }
 0x1cb   :  { %v392_v20 = vadd.f32 %v391_v12, %v351_v16 }
 0x1cd   :  { %v400_v21 = vmax.f32 %v392_v20, 0.0 }
 0x1cf   :  { %v404_v31 = vpack.c.bf16 %v400_v21, %v399_v30 }
 0x1d2   :  { %v394_v15 = vpop.f32.mrf.mxu1 }
 0x1d3   :  { %v395_v17 = vadd.f32 %v394_v15, %v356_v14 }
 0x1d5   :  { %v401_v27 = vmax.f32 %v395_v17, 0.0 }
 0x1da   :  { %v396_v19 = vpop.f32.mrf.mxu1 }
 0x1db   :  { %v397_v25 = vadd.f32 %v396_v19, %v361_v18 }
 0x1dd   :  { %v402_v28 = vmax.f32 %v397_v25, 0.0 }
 0x1df   :  { %v405_v29 = vpack.c.bf16 %v402_v28, %v401_v27 }
 0x1e1   :  { %421 = vmatpush.bf16.msrb.mxu1 %v405_v29 }
 0x1e5   :  { %422 = vmatpush.bf16.msrb.mxu1 %v404_v31 }
 0x1e8   :  { %512 = vmatmul.msk.bf16.vlgmr.msrb.gmra.mxu1 %vm373_vm9, %v403_v32 }
 0x265   :  { %v424_v33 = vpop.f32.mrf.mxu1 }
 0x266   :  { %v425_v34 = vadd.f32 %v424_v33, %v410_v22 }
 0x268   :  { %428 = vst [vmem:[#allocation7] sm:$0xff] %v425_v34 }
 0x269   :  { %439 = dma.vmem_to_hbm [thread:$0]  %s435_s30, 128, %s437_s10, [#allocation4]  }
 0x26d   :  { %v426_v35 = vpop.f32.mrf.mxu1 }
 0x26e   :  { %639 = dma.done.wait [#allocation4], 128  }
 0x26f   :  { %640 = vsyncadd [#allocation4], 4294967168 }
 0x270   :  { %444 = vsyncpa [#allocation3], 1 }
 0x271   :  { %445 = vsyncpa [#allocation6], 1 }
 0x272   :  { %446 = vsyncpa [#allocation4], 1 }

</bundles_post_ra>
